<compile_context>
chip_gen: v6e
topology: v6e:2x2x1
jax: 0.10.0
libtpu: 0.0.40
codegen_flags: <defaults>
</compile_context>

<pallas_src>
import jax
import jax.numpy as jnp
from jax.experimental import pallas as pl
from jax.experimental.pallas import tpu as pltpu

LANE = 128
SUBLANE = 8


def _round_up(n, m):
    return ((n + m - 1) // m) * m


def _cdiv(a, b):
    return -(-a // b)


def mlp_kernel(x_ref, w1_ref, b1_ref, w2_ref, b2_ref, w3_ref, b3_ref, out_ref):
    # Three MXU matmuls with f32 accumulation + ReLU on the VPU.  In bf16 mode
    # the input is cast in-kernel (no extra XLA pass); biases stay f32.
    x = x_ref[...].astype(w1_ref.dtype)
    h1 = jnp.dot(x, w1_ref[...], preferred_element_type=jnp.float32) + b1_ref[...]
    h1 = jnp.maximum(h1, 0.0).astype(w2_ref.dtype)
    h2 = jnp.dot(h1, w2_ref[...], preferred_element_type=jnp.float32) + b2_ref[...]
    h2 = jnp.maximum(h2, 0.0).astype(w3_ref.dtype)
    out = jnp.dot(h2, w3_ref[...], preferred_element_type=jnp.float32) + b3_ref[...]
    od = out_ref.shape[-1]                 # narrow (output_dim) or padded (128)
    out_ref[...] = out[:, :od].astype(out_ref.dtype)


def pad_params(params, dtype=jnp.float32):
    """Zero-pad hidden/output feature dims to 128-lane multiples (math preserved).

    Weights are cast to `dtype` once here (e.g. bf16 for MXU throughput mode);
    biases stay f32 since they are added after the f32 accumulation.
    in_dim is deliberately left unpadded (see header note).
    """
    def pad2(a, rows, cols):
        return jnp.pad(a, ((0, rows - a.shape[0]), (0, cols - a.shape[1])))

    in_dim, hidden = params["w1"].shape
    out_dim = params["w3"].shape[1]
    hp = _round_up(hidden, LANE)
    op = _round_up(out_dim, LANE)
    return {
        "w1": pad2(params["w1"], in_dim, hp).astype(dtype),
        "b1": pad2(params["b1"], 1, hp),
        "w2": pad2(params["w2"], hp, hp).astype(dtype),
        "b2": pad2(params["b2"], 1, hp),
        "w3": pad2(params["w3"], hp, op).astype(dtype),
        "b3": pad2(params["b3"], 1, op),
    }


def network_forward(x, padded_params, output_dim, *, block_batch=2048,
                    lane_dense_output=False):
    """x: (batch, input_dim) f32.  padded_params: output of pad_params()."""
    w1, b1 = padded_params["w1"], padded_params["b1"]
    w2, b2 = padded_params["w2"], padded_params["b2"]
    w3, b3 = padded_params["w3"], padded_params["b3"]

    batch, in_dim = x.shape
    hp = w1.shape[1]   # padded hidden (128)
    op = w3.shape[1]   # padded output dim (multiple of 128)

    # ---- batch tiling --------------------------------------------------------
    # Large tiles amortize the ~0.35 us per-grid-step cost; tb is a multiple of
    # 8 sublanes.  When more than one step is needed, force an even step count
    # so v7x's two TensorCores (dimension_semantics="parallel") balance.
    tb = min(_round_up(block_batch, SUBLANE), _round_up(batch, SUBLANE))
    steps = _cdiv(batch, tb)
    if steps > 1 and steps % 2 == 1:
        steps += 1
        tb = _round_up(_cdiv(batch, steps), SUBLANE)
    padded_batch = steps * tb
    if padded_batch != batch:
        x = jnp.pad(x, ((0, padded_batch - batch), (0, 0)))

    # Narrow output (default): (padded_batch, output_dim) — 64x fewer writeback
    # bytes for tiny output_dim and no post-kernel lane slice.  Lane-dense
    # alternative keeps the padded 128-wide slab (unmasked vst path).
    out_cols = op if lane_dense_output else output_dim

    const = lambda i: (0, 0)   # weights/biases: same block every step (VMEM-resident)

    flops = 2 * padded_batch * (in_dim * hp + hp * hp + hp * op)
    bytes_accessed = int(
        x.size * x.dtype.itemsize
        + padded_batch * out_cols * 4
        + sum(int(a.size) * a.dtype.itemsize for a in (w1, b1, w2, b2, w3, b3))
    )
    cost = pl.CostEstimate(flops=flops, transcendentals=0,
                           bytes_accessed=bytes_accessed)

    cp_kwargs = dict(dimension_semantics=("parallel",))
    if tb > 4096:
        # v5e scoped-VMEM default is 16 MiB; raise it only when the tile needs it.
        cp_kwargs["vmem_limit_bytes"] = 32 * 1024 * 1024

    out_padded = pl.pallas_call(
        mlp_kernel,
        out_shape=jax.ShapeDtypeStruct((padded_batch, out_cols), jnp.float32),
        grid_spec=pltpu.PrefetchScalarGridSpec(
            num_scalar_prefetch=0,
            grid=(steps,),
            in_specs=[
                pl.BlockSpec((tb, in_dim), lambda i: (i, 0)),
                pl.BlockSpec((in_dim, hp), const),
                pl.BlockSpec((1, hp), const),
                pl.BlockSpec((hp, hp), const),
                pl.BlockSpec((1, hp), const),
                pl.BlockSpec((hp, op), const),
                pl.BlockSpec((1, op), const),
            ],
            out_specs=pl.BlockSpec((tb, out_cols), lambda i: (i, 0)),
        ),
        compiler_params=pltpu.CompilerParams(**cp_kwargs),
        cost_estimate=cost,
    )(x, w1, b1, w2, b2, w3, b3)

    out = out_padded[:batch]
    if lane_dense_output:
        out = out[:, :output_dim]
    return out


def init_params(key, input_dimension, output_dimension, hidden=100):
    """Deterministic init mimicking torch.nn.Linear default (uniform +-1/sqrt(fan_in))."""
    ks = jax.random.split(key, 6)

    def linear(kw, kb, fan_in, fan_out):
        bound = 1.0 / jnp.sqrt(float(fan_in))
        w = jax.random.uniform(kw, (fan_in, fan_out), jnp.float32, -bound, bound)
        b = jax.random.uniform(kb, (1, fan_out), jnp.float32, -bound, bound)
        return w, b

    w1, b1 = linear(ks[0], ks[1], input_dimension, hidden)
    w2, b2 = linear(ks[2], ks[3], hidden, hidden)
    w3, b3 = linear(ks[4], ks[5], hidden, output_dimension)
    return {"w1": w1, "b1": b1, "w2": w2, "b2": b2, "w3": w3, "b3": b3}


def reference_forward(x, params):
    h1 = jnp.maximum(x @ params["w1"] + params["b1"], 0.0)
    h2 = jnp.maximum(h1 @ params["w2"] + params["b2"], 0.0)
    return h2 @ params["w3"] + params["b3"]


if __name__ == "__main__":
    key = jax.random.PRNGKey(0)
    k_x, k_p = jax.random.split(key)

    batch = 8
    input_dimension = 4
    output_dimension = 2

    params = init_params(k_p, input_dimension, output_dimension)
    padded_f32 = pad_params(params)                        # pad/cast once, reuse
    padded_bf16 = pad_params(params, dtype=jnp.bfloat16)   # bf16 weights, f32 biases

    # Small-batch check (single grid step), f32, narrow output.
    x = jax.random.normal(k_x, (batch, input_dimension), dtype=jnp.float32)
    ref = reference_forward(x, params)
    out = jax.block_until_ready(network_forward(x, padded_f32, output_dimension))
    assert out.shape == (batch, output_dimension)
    assert jnp.allclose(out, ref, atol=1e-4, rtol=1e-4)

    # Larger batch: odd cdiv -> evened grid-step count, multiple parallel steps.
    big_batch = 4100
    xb = jax.random.normal(k_x, (big_batch, input_dimension), dtype=jnp.float32)
    refb = reference_forward(xb, params)
    outb = jax.block_until_ready(network_forward(xb, padded_f32, output_dimension))
    assert outb.shape == (big_batch, output_dimension)
    assert jnp.allclose(outb, refb, atol=1e-4, rtol=1e-4)

    # Lane-dense (padded 128-wide) output variant for comparison.
    outb_dense = jax.block_until_ready(
        network_forward(xb, padded_f32, output_dimension, lane_dense_output=True))
    assert outb_dense.shape == (big_batch, output_dimension)
    assert jnp.allclose(outb_dense, refb, atol=1e-4, rtol=1e-4)

    # bf16 weights / in-kernel x cast, f32 accumulation (v6e/v7x throughput mode).
    outb_bf16 = jax.block_until_ready(
        network_forward(xb, padded_bf16, output_dimension))
    assert jnp.allclose(outb_bf16, refb, atol=1e-1, rtol=5e-2)

    print("KERNEL_OK")
</pallas_src>

<mosaic_0001>
module attributes {stable_mosaic.version = 11 : i64} {
  func.func @mlp_kernel(%arg0: i32, %arg1: memref<8x4xf32, #tpu.memory_space<vmem>>, %arg2: memref<4x128xf32, #tpu.memory_space<vmem>>, %arg3: memref<1x128xf32, #tpu.memory_space<vmem>>, %arg4: memref<128x128xf32, #tpu.memory_space<vmem>>, %arg5: memref<1x128xf32, #tpu.memory_space<vmem>>, %arg6: memref<128x128xf32, #tpu.memory_space<vmem>>, %arg7: memref<1x128xf32, #tpu.memory_space<vmem>>, %arg8: memref<8x2xf32, #tpu.memory_space<vmem>>) attributes {dimension_semantics = [#tpu.dimension_semantics<parallel>], iteration_bounds = array<i64: 1>, scalar_prefetch = 0 : i64, scratch_operands = 0 : i64, tpu.core_type = #tpu.core_type<tc>, window_params = [{transform_indices = @transform_0, window_bounds = array<i64: 8, 4>}, {pipeline_mode = #tpu.pipeline_mode<synchronous>, transform_indices = @transform_1, window_bounds = array<i64: 4, 128>}, {pipeline_mode = #tpu.pipeline_mode<synchronous>, transform_indices = @transform_2, window_bounds = array<i64: 1, 128>}, {pipeline_mode = #tpu.pipeline_mode<synchronous>, transform_indices = @transform_3, window_bounds = array<i64: 128, 128>}, {pipeline_mode = #tpu.pipeline_mode<synchronous>, transform_indices = @transform_4, window_bounds = array<i64: 1, 128>}, {pipeline_mode = #tpu.pipeline_mode<synchronous>, transform_indices = @transform_5, window_bounds = array<i64: 128, 128>}, {pipeline_mode = #tpu.pipeline_mode<synchronous>, transform_indices = @transform_6, window_bounds = array<i64: 1, 128>}, {transform_indices = @transform_7, window_bounds = array<i64: 8, 2>}]} {
    %c0 = arith.constant 0 : index
    %c0_0 = arith.constant 0 : index
    %0 = vector.load %arg1[%c0, %c0_0] : memref<8x4xf32, #tpu.memory_space<vmem>>, vector<8x4xf32>
    %c0_1 = arith.constant 0 : index
    %c0_2 = arith.constant 0 : index
    %1 = vector.load %arg2[%c0_1, %c0_2] : memref<4x128xf32, #tpu.memory_space<vmem>>, vector<4x128xf32>
    %cst = arith.constant dense<0.000000e+00> : vector<8x128xf32>
    %2 = tpu.matmul %0, %1, %cst {dimension_numbers = #tpu.dot_dimension_numbers<[1], [0], [0], [1], [0, 0, 1, 1], [], []>} : vector<8x4xf32>, vector<4x128xf32>, vector<8x128xf32> -> vector<8x128xf32>
    %c0_3 = arith.constant 0 : index
    %c0_4 = arith.constant 0 : index
    %3 = vector.load %arg3[%c0_3, %c0_4] : memref<1x128xf32, #tpu.memory_space<vmem>>, vector<1x128xf32>
    %4 = vector.broadcast %3 : vector<1x128xf32> to vector<8x128xf32>
    %5 = arith.addf %2, %4 : vector<8x128xf32>
    %cst_5 = arith.constant 0.000000e+00 : f32
    %6 = vector.broadcast %cst_5 : f32 to vector<8x128xf32>
    %7 = arith.maximumf %5, %6 : vector<8x128xf32>
    %c0_6 = arith.constant 0 : index
    %c0_7 = arith.constant 0 : index
    %8 = vector.load %arg4[%c0_6, %c0_7] : memref<128x128xf32, #tpu.memory_space<vmem>>, vector<128x128xf32>
    %cst_8 = arith.constant dense<0.000000e+00> : vector<8x128xf32>
    %9 = tpu.matmul %7, %8, %cst_8 {dimension_numbers = #tpu.dot_dimension_numbers<[1], [0], [0], [1], [0, 0, 1, 1], [], []>} : vector<8x128xf32>, vector<128x128xf32>, vector<8x128xf32> -> vector<8x128xf32>
    %c0_9 = arith.constant 0 : index
    %c0_10 = arith.constant 0 : index
    %10 = vector.load %arg5[%c0_9, %c0_10] : memref<1x128xf32, #tpu.memory_space<vmem>>, vector<1x128xf32>
    %11 = vector.broadcast %10 : vector<1x128xf32> to vector<8x128xf32>
    %12 = arith.addf %9, %11 : vector<8x128xf32>
    %cst_11 = arith.constant 0.000000e+00 : f32
    %13 = vector.broadcast %cst_11 : f32 to vector<8x128xf32>
    %14 = arith.maximumf %12, %13 : vector<8x128xf32>
    %c0_12 = arith.constant 0 : index
    %c0_13 = arith.constant 0 : index
    %15 = vector.load %arg6[%c0_12, %c0_13] : memref<128x128xf32, #tpu.memory_space<vmem>>, vector<128x128xf32>
    %cst_14 = arith.constant dense<0.000000e+00> : vector<8x128xf32>
    %16 = tpu.matmul %14, %15, %cst_14 {dimension_numbers = #tpu.dot_dimension_numbers<[1], [0], [0], [1], [0, 0, 1, 1], [], []>} : vector<8x128xf32>, vector<128x128xf32>, vector<8x128xf32> -> vector<8x128xf32>
    %c0_15 = arith.constant 0 : index
    %c0_16 = arith.constant 0 : index
    %17 = vector.load %arg7[%c0_15, %c0_16] : memref<1x128xf32, #tpu.memory_space<vmem>>, vector<1x128xf32>
    %18 = vector.broadcast %17 : vector<1x128xf32> to vector<8x128xf32>
    %19 = arith.addf %16, %18 : vector<8x128xf32>
    %20 = vector.extract_strided_slice %19 {offsets = [0, 0], sizes = [8, 2], strides = [1, 1]} : vector<8x128xf32> to vector<8x2xf32>
    %c0_17 = arith.constant 0 : index
    %c0_18 = arith.constant 0 : index
    %21 = vector.load %arg8[%c0_17, %c0_18] : memref<8x2xf32, #tpu.memory_space<vmem>>, vector<8x2xf32>
    tpu.vector_store %arg8[%c0_17, %c0_18], %20 {strides = array<i32>} : memref<8x2xf32, #tpu.memory_space<vmem>>, vector<8x2xf32>,
    return
  }
  func.func @transform_0(%arg0: i32) -> (i32, i32) {
    %c0_i32 = arith.constant 0 : i32
    %c0_i32_0 = arith.constant 0 : i32
    return %arg0, %c0_i32 : i32, i32
  }
  func.func @transform_1(%arg0: i32) -> (i32, i32) {
    %c0_i32 = arith.constant 0 : i32
    %c0_i32_0 = arith.constant 0 : i32
    %c0_i32_1 = arith.constant 0 : i32
    return %c0_i32, %c0_i32_0 : i32, i32
  }
  func.func @transform_2(%arg0: i32) -> (i32, i32) {
    %c0_i32 = arith.constant 0 : i32
    %c0_i32_0 = arith.constant 0 : i32
    %c0_i32_1 = arith.constant 0 : i32
    return %c0_i32, %c0_i32_0 : i32, i32
  }
  func.func @transform_3(%arg0: i32) -> (i32, i32) {
    %c0_i32 = arith.constant 0 : i32
    %c0_i32_0 = arith.constant 0 : i32
    %c0_i32_1 = arith.constant 0 : i32
    return %c0_i32, %c0_i32_0 : i32, i32
  }
  func.func @transform_4(%arg0: i32) -> (i32, i32) {
    %c0_i32 = arith.constant 0 : i32
    %c0_i32_0 = arith.constant 0 : i32
    %c0_i32_1 = arith.constant 0 : i32
    return %c0_i32, %c0_i32_0 : i32, i32
  }
  func.func @transform_5(%arg0: i32) -> (i32, i32) {
    %c0_i32 = arith.constant 0 : i32
    %c0_i32_0 = arith.constant 0 : i32
    %c0_i32_1 = arith.constant 0 : i32
    return %c0_i32, %c0_i32_0 : i32, i32
  }
  func.func @transform_6(%arg0: i32) -> (i32, i32) {
    %c0_i32 = arith.constant 0 : i32
    %c0_i32_0 = arith.constant 0 : i32
    %c0_i32_1 = arith.constant 0 : i32
    return %c0_i32, %c0_i32_0 : i32, i32
  }
  func.func @transform_7(%arg0: i32) -> (i32, i32) {
    %c0_i32 = arith.constant 0 : i32
    %c0_i32_0 = arith.constant 0 : i32
    return %arg0, %c0_i32 : i32, i32
  }
}

</mosaic_0001>

<bundles_post_ra>
// kernel: tpu_custom_call.1
= control target key start
LH: loop header
LB: loop body
LE: loop exit
PB: predicated region body
PF: predicated region fallthrough
CT: control target
= control target key end

     0   :  { %12 = vsyncpa [#allocation3], 0  ;;  %s612_s0 = inlined_call_operand.vmem [shape: f32[8,4], index: 0, kind: input, shape index: {}]   ;;  %s613_s1 = inlined_call_operand.vmem [shape: f32[4,128], index: 1, kind: input, shape index: {}]   ;;  %s614_s2 = inlined_call_operand.vmem [shape: f32[1,128], index: 2, kind: input, shape index: {}]   ;;  %s615_s3 = inlined_call_operand.hbm [shape: f32[128,128], index: 3, kind: input, shape index: {}]   ;;  %s616_s4 = inlined_call_operand.vmem [shape: f32[1,128], index: 4, kind: input, shape index: {}]   ;;  %s617_s5 = inlined_call_operand.hbm [shape: f32[128,128], index: 5, kind: input, shape index: {}]   ;;  %s618_s6 = inlined_call_operand.vmem [shape: f32[1,128], index: 6, kind: input, shape index: {}]   ;;  %s619_s7 = inlined_call_operand.vmem [shape: f32[8,2], index: 7, kind: output, shape index: {}]  }
   0x1   :  { %13 = vsyncpa [#allocation5], 0  ;;  %s503_s24 = smov [#allocation2]  }
   0x2   :  { %s25_s25 = sshll.u32 %s503_s24, 4  ;;  %s26_s25 = int_to_ptr.vmem [resolvable:$true] %s25_s25 }
   0x3   :  { %s467_s26 = scalar_lea.vmem %s26_s25, 2048  ;;  %p472_p1 = scmp.lt.s32.totalorder %s26_s25, %s26_s25 }
   0x4   :  { %p468_p0 = scmp.ne.s32.totalorder %s26_s25, %s467_s26  ;;  %p473_p2 = scmp.lt.s32.totalorder %s467_s26, %s467_s26 }
   0x6   :  { %p474_p3 = por %p473_p2, %p472_p1 }
   0x8   :  { %p475_p4 = pnand %p474_p3, %p468_p0 }
   0xa   :  { %478 = shalt.err (!%p475_p4)
}
   0xb   :  { %s504_s27 = smov 128   ;;  %s505_s28 = smov 8  }
   0xc   :  { %31 = dma.hbm_to_vmem [thread:$0]  %s615_s3, 2048, %s26_s25, [#allocation3], %s504_s27, %s504_s27, %s505_s28  }
   0xd   :  { %s506_s8 = smov [#allocation4]  }
   0xe   :  { %s39_s9 = sshll.u32 %s506_s8, 4  ;;  %s40_s9 = int_to_ptr.vmem [resolvable:$true] %s39_s9 }
   0xf   :  { %s487_s10 = scalar_lea.vmem %s40_s9, 2048  ;;  %p492_p6 = scmp.lt.s32.totalorder %s40_s9, %s40_s9 }
  0x10   :  { %p488_p5 = scmp.ne.s32.totalorder %s40_s9, %s487_s10  ;;  %p493_p7 = scmp.lt.s32.totalorder %s487_s10, %s487_s10 }
  0x12   :  { %p494_p8 = por %p493_p7, %p492_p6 }
  0x14   :  { %p495_p9 = pnand %p494_p8, %p488_p5 }
  0x16   :  { %498 = shalt.err (!%p495_p9)
}
  0x17   :  { %45 = dma.hbm_to_vmem [thread:$0]  %s617_s5, 2048, %s40_s9, [#allocation5], %s504_s27, %s504_s27, %s505_s28  }
  0x18   :  { %499 = dma.done.wait [#allocation3], 2048  }
  0x19   :  { %500 = vsyncadd [#allocation3], 4294965248 }
  0x1a   :  { %501 = dma.done.wait [#allocation5], 2048  }
  0x1b   :  { %502 = vsyncadd [#allocation5], 4294965248  ;;  %v507_v0 = vmov 0.0   ;;  %vm508_vm0 = vmmov 0   ;;  %vm67_vm1 = vcmask 1043456   ;;  %vm63_vm2 = vcmask 31744  }
  0x1c   :  { %378 = vmatprep.subr.mxu0 %v507_v0  ;;  %380 = vmatprep.mubr.msk.f32.mxu0 %vm508_vm0, %v507_v0  ;;  %v55_v1 = vld [vmem:[%s613_s1] sm:$0xf]  ;;  %v157_v3 = vld [vmem:[#allocation2 + $0x78] sm:$0xff]  ;;  %v156_v4 = vld [vmem:[#allocation2 + $0x70] sm:$0xff]  ;;  %vm329_vm3 = vcmask 15360  }
  0x1d   :  { %383 = vmatprep.subr.mxu1 %v507_v0  ;;  %415 = vmatprep.mubr.msk.f32.mxu1 %vm508_vm0, %v507_v0  ;;  %v54_v2 = vld [vmem:[%s612_s0] sm:$0xff]  ;;  %v155_v5 = vld [vmem:[#allocation2 + $0x68] sm:$0xff]  ;;  %v153_v7 = vld [vmem:[#allocation2 + $0x58] sm:$0xff] }
  0x1e   :  { %379 = vmatpush3.msk.msra.mxu0 %vm67_vm1, %v55_v1  ;;  %384 = vmatpush3.msra.mxu1 %v157_v3  ;;  %v154_v6 = vld [vmem:[#allocation2 + $0x60] sm:$0xff]  ;;  %v152_v8 = vld [vmem:[#allocation2 + $0x50] sm:$0xff]  ;;  %v151_v9 = vld [vmem:[#allocation2 + $0x48] sm:$0xff] }
  0x1f   :  { %381 = vmatmul.mubr.msk.f32.vlgmr.msra.gmra.mxu0 %vm63_vm2, %v54_v2  ;;  %385 = vmatprep.subr.mxu1 %v507_v0  ;;  %v150_v10 = vld [vmem:[#allocation2 + $0x40] sm:$0xff]  ;;  %v149_v11 = vld [vmem:[#allocation2 + $0x38] sm:$0xff]  ;;  %v148_v12 = vld [vmem:[#allocation2 + $0x30] sm:$0xff] }
  0x20   :  { %386 = vmatpush3.msra.mxu1 %v156_v4  ;;  %418 = vmatprep.subr.mxu0 %v507_v0  ;;  %v147_v13 = vld [vmem:[#allocation2 + $0x28] sm:$0xff]  ;;  %v146_v14 = vld [vmem:[#allocation2 + $0x20] sm:$0xff]  ;;  %v145_v15 = vld [vmem:[#allocation2 + $0x18] sm:$0xff] }
  0x21   :  { %387 = vmatprep.subr.mxu1 %v507_v0  ;;  %450 = vmatprep.mubr.msk.f32.mxu0 %vm508_vm0, %v507_v0  ;;  %v144_v16 = vld [vmem:[#allocation2 + $0x10] sm:$0xff]  ;;  %v143_v17 = vld [vmem:[#allocation2 + $0x8] sm:$0xff]  ;;  %v142_v18 = vld [vmem:[#allocation2] sm:$0xff] }
  0x22   :  { %388 = vmatpush3.msra.mxu1 %v155_v5  ;;  %v251_v19 = vld [vmem:[#allocation4 + $0x78] sm:$0xff]  ;;  %v250_v20 = vld [vmem:[#allocation4 + $0x70] sm:$0xff]  ;;  %v249_v21 = vld [vmem:[#allocation4 + $0x68] sm:$0xff] }
  0x23   :  { %389 = vmatprep.subr.mxu1 %v507_v0  ;;  %419 = vmatpush3.msra.mxu0 %v251_v19  ;;  %v248_v22 = vld [vmem:[#allocation4 + $0x60] sm:$0xff]  ;;  %v247_v23 = vld [vmem:[#allocation4 + $0x58] sm:$0xff]  ;;  %v246_v24 = vld [vmem:[#allocation4 + $0x50] sm:$0xff] }
  0x24   :  { %390 = vmatpush3.msra.mxu1 %v154_v6  ;;  %420 = vmatprep.subr.mxu0 %v507_v0  ;;  %v245_v25 = vld [vmem:[#allocation4 + $0x48] sm:$0xff]  ;;  %v244_v26 = vld [vmem:[#allocation4 + $0x40] sm:$0xff]  ;;  %v243_v27 = vld [vmem:[#allocation4 + $0x38] sm:$0xff] }
  0x25   :  { %391 = vmatprep.subr.mxu1 %v507_v0  ;;  %421 = vmatpush3.msra.mxu0 %v250_v20  ;;  %v242_v28 = vld [vmem:[#allocation4 + $0x30] sm:$0xff]  ;;  %v241_v29 = vld [vmem:[#allocation4 + $0x28] sm:$0xff]  ;;  %v240_v30 = vld [vmem:[#allocation4 + $0x20] sm:$0xff] }
  0x26   :  { %392 = vmatpush3.msra.mxu1 %v153_v7  ;;  %422 = vmatprep.subr.mxu0 %v507_v0  ;;  %v239_v31 = vld [vmem:[#allocation4 + $0x18] sm:$0xff]  ;;  %v337_v32 = vld [vmem:[%s614_s2] ss:$0 sm:$0xff]  ;;  %v238_v37 = vld [vmem:[#allocation4 + $0x10] sm:$0xff] }
  0x27   :  { %393 = vmatprep.subr.mxu1 %v507_v0  ;;  %423 = vmatpush3.msra.mxu0 %v249_v21  ;;  %v237_v38 = vld [vmem:[#allocation4 + $0x8] sm:$0xff]  ;;  %v236_v39 = vld [vmem:[#allocation4] sm:$0xff] }
  0x28   :  { %394 = vmatpush3.msra.mxu1 %v152_v8  ;;  %424 = vmatprep.subr.mxu0 %v507_v0  ;;  %v340_v40 = vld [vmem:[%s616_s4] ss:$0 sm:$0xff] }
  0x29   :  { %395 = vmatprep.subr.mxu1 %v507_v0  ;;  %425 = vmatpush3.msra.mxu0 %v248_v22  ;;  %v341_v45 = vld [vmem:[%s618_s6] ss:$0 sm:$0xff] }
  0x2a   :  { %396 = vmatpush3.msra.mxu1 %v151_v9  ;;  %426 = vmatprep.subr.mxu0 %v507_v0 }
  0x2b   :  { %397 = vmatprep.subr.mxu1 %v507_v0  ;;  %427 = vmatpush3.msra.mxu0 %v247_v23 }
  0x2c   :  { %398 = vmatpush3.msra.mxu1 %v150_v10  ;;  %428 = vmatprep.subr.mxu0 %v507_v0 }
  0x2d   :  { %399 = vmatprep.subr.mxu1 %v507_v0  ;;  %429 = vmatpush3.msra.mxu0 %v246_v24 }
  0x2e   :  { %400 = vmatpush3.msra.mxu1 %v149_v11  ;;  %430 = vmatprep.subr.mxu0 %v507_v0 }
  0x2f   :  { %401 = vmatprep.subr.mxu1 %v507_v0  ;;  %431 = vmatpush3.msra.mxu0 %v245_v25 }
  0x30   :  { %402 = vmatpush3.msra.mxu1 %v148_v12  ;;  %432 = vmatprep.subr.mxu0 %v507_v0 }
  0x31   :  { %403 = vmatprep.subr.mxu1 %v507_v0  ;;  %433 = vmatpush3.msra.mxu0 %v244_v26 }
  0x32   :  { %404 = vmatpush3.msra.mxu1 %v147_v13  ;;  %434 = vmatprep.subr.mxu0 %v507_v0 }
  0x33   :  { %405 = vmatprep.subr.mxu1 %v507_v0  ;;  %435 = vmatpush3.msra.mxu0 %v243_v27 }
  0x34   :  { %406 = vmatpush3.msra.mxu1 %v146_v14  ;;  %436 = vmatprep.subr.mxu0 %v507_v0 }
  0x35   :  { %407 = vmatprep.subr.mxu1 %v507_v0  ;;  %437 = vmatpush3.msra.mxu0 %v242_v28 }
  0x36   :  { %408 = vmatpush3.msra.mxu1 %v145_v15  ;;  %438 = vmatprep.subr.mxu0 %v507_v0 }
  0x37   :  { %409 = vmatprep.subr.mxu1 %v507_v0  ;;  %439 = vmatpush3.msra.mxu0 %v241_v29 }
  0x38   :  { %410 = vmatpush3.msra.mxu1 %v144_v16  ;;  %440 = vmatprep.subr.mxu0 %v507_v0 }
  0x39   :  { %411 = vmatprep.subr.mxu1 %v507_v0  ;;  %441 = vmatpush3.msra.mxu0 %v240_v30 }
  0x3a   :  { %412 = vmatpush3.msra.mxu1 %v143_v17  ;;  %442 = vmatprep.subr.mxu0 %v507_v0 }
  0x3b   :  { %413 = vmatprep.subr.mxu1 %v507_v0  ;;  %443 = vmatpush3.msra.mxu0 %v239_v31 }
  0x3c   :  { %414 = vmatpush3.msra.mxu1 %v142_v18  ;;  %444 = vmatprep.subr.mxu0 %v507_v0 }
  0x3d   :  { %445 = vmatpush3.msra.mxu0 %v238_v37 }
  0x3e   :  { %446 = vmatprep.subr.mxu0 %v507_v0 }
  0x3f   :  { %447 = vmatpush3.msra.mxu0 %v237_v38 }
  0x40   :  { %448 = vmatprep.subr.mxu0 %v507_v0 }
  0x41   :  { %449 = vmatpush3.msra.mxu0 %v236_v39 }
  0xdf   :  { %v137_v33 = vpop.f32.mrf.mxu0 }
  0xe0   :  { %v138_v34 = vadd.f32 %v337_v32, %v137_v33 }
  0xe1   :  { %v382_v35 = vpop.f32.mrf.mxu0 }
  0xe2   :  { %v141_v36 = vmax.f32 %v138_v34, 0.0 }
  0xe4   :  { %416 = vmatmul.mubr.f32.vlgmr.msra.gmra.mxu1 %v141_v36 }
 0x1a4   :  { %v231_v41 = vpop.f32.mrf.mxu1 }
 0x1a5   :  { %v232_v42 = vadd.f32 %v340_v40, %v231_v41 }
 0x1a6   :  { %v417_v43 = vpop.f32.mrf.mxu1 }
 0x1a7   :  { %v235_v44 = vmax.f32 %v232_v42, 0.0 }
 0x1a9   :  { %451 = vmatmul.mubr.f32.vlgmr.msra.gmra.mxu0 %v235_v44 }
 0x269   :  { %v325_v46 = vpop.f32.mrf.mxu0 }
 0x26a   :  { %v326_v47 = vadd.f32 %v341_v45, %v325_v46 }
 0x26b   :  { %v452_v48 = vpop.f32.mrf.mxu0 }
 0x26c   :  { %330 = vst.msk [vmem:[%s619_s7] sm:$0xff] %vm329_vm3, %v326_v47 }
 0x26d   :  { %335 = vsyncpa [#allocation3], 1 }
 0x26e   :  { %336 = vsyncpa [#allocation5], 1 }

</bundles_post_ra>
